<compile_context>
chip_gen: v6e
topology: v6e:2x2x1
jax: 0.10.0
libtpu: 0.0.40
codegen_flags: <defaults>
</compile_context>

<pallas_src>
import functools

import jax
import jax.numpy as jnp
from jax.experimental import pallas as pl
from jax.experimental.pallas import tpu as pltpu


def _elu(x):
    # ELU(alpha=1): x if x > 0 else exp(x) - 1  (exp clamped for safety)
    return jnp.where(x > 0, x, jnp.exp(jnp.minimum(x, 0.0)) - 1.0)


def _shift_lanes(v, lanes):
    """out[:, c] = v[:, c + lanes], zero-filled where c + lanes is out of range."""
    L = v.shape[1]
    if lanes == 0:
        return v
    if abs(lanes) >= L:
        return jnp.zeros_like(v)
    zeros = jnp.zeros((v.shape[0], abs(lanes)), v.dtype)
    if lanes > 0:
        return jnp.concatenate([v[:, lanes:], zeros], axis=1)
    return jnp.concatenate([zeros, v[:, :L + lanes]], axis=1)


def _eegnet_kernel(Chans, K1, NB,
                   x_ref,      # (4*Chans, LT)   bf16  row = p*Chans + c, col = t4*NB + b
                   wc1_ref,    # (F1D, K1*Chans) bf16  fused block-1 weight
                   bc1_ref,    # (F1D, 1)        f32
                   wc2_ref,    # (F2, 16*F1D)    bf16  fused block-2 weight
                   bc2_ref,    # (F2, 1)         f32
                   out_ref):   # (F2, LT)        f32   post-ELU, pre-pool8
    LT = x_ref.shape[1]                      # NB * S4
    padL1 = K1 // 2 - 1
    bf16 = jnp.bfloat16

    xph = x_ref[...]                                             # (4*Chans, LT) bf16

    # ---------------- block 1: phase-split im2col (pool-4 folded in) ---------
    # Output sample t = 4*t4 + r (phase r in 0..3); temporal tap k reads
    # x at t + k - padL1 = 4*(t4 + d) + p  with  (d, p) = divmod(r + k - padL1, 4).
    # Distinct (p, d) slabs are shared across phases/taps: K1 + 3 slabs total.
    qmin, qmax = -padL1, 3 + (K1 - 1 - padL1)
    slabs = []
    for q in range(qmin, qmax + 1):
        d, p = divmod(q, 4)
        slabs.append(_shift_lanes(xph[p * Chans:(p + 1) * Chans, :], d * NB))
    big = jnp.concatenate(slabs, axis=0)                         # ((K1+3)*Chans, LT)

    KC = K1 * Chans
    # Phase r uses slabs q = r-padL1 .. r-padL1+K1-1 == big rows [r*Chans, r*Chans+KC).
    im1 = jnp.concatenate(
        [big[r * Chans:r * Chans + KC, :] for r in range(4)], axis=1)  # (KC, 4*LT) bf16

    # temporal conv + depthwise spatial conv + BN1/BN2 fused -> ONE MXU matmul
    # over all 4 phases at once (lane-dense RHS of width 4*LT).
    y = jnp.dot(wc1_ref[...], im1,
                preferred_element_type=jnp.float32) + bc1_ref[...]     # (F1D, 4*LT)
    y = _elu(y)
    # AvgPool(1,4) == f32 mean of the four phase blocks (no pooling matrix).
    y2 = 0.25 * (y[:, 0:LT] + y[:, LT:2 * LT] + y[:, 2 * LT:3 * LT] + y[:, 3 * LT:4 * LT])

    # ---------------- block 2: at pooled resolution ---------------------------
    # pad(7,8) + depthwise (1,16) conv + BN3 + 1x1 conv + BN4 fused -> one matmul.
    y2b = y2.astype(bf16)
    im2 = jnp.concatenate(
        [_shift_lanes(y2b, (k - 7) * NB) for k in range(16)], axis=0)  # (16*F1D, LT) bf16
    z = jnp.dot(wc2_ref[...], im2,
                preferred_element_type=jnp.float32) + bc2_ref[...]     # (F2, LT)
    out_ref[...] = _elu(z)            # AvgPool(1,8) + reshape happen in the wrapper


def eegnet_forward(x, params, *, Chans, Samples, kernLenght, F1, D, F2,
                   batch_tile=None):
    N = x.shape[0]
    S, K1 = Samples, kernLenght
    assert x.shape == (N, 1, Chans, S)
    assert S % 32 == 0, "Samples must be divisible by 4*8 = 32"
    S4, S32 = S // 4, S // 32
    F1D = F1 * D
    bf16 = jnp.bfloat16

    w1f, b1, wdwf, b2, wtf, b3, wpf, b4 = params

    # Batch tile per grid step.  Default: whole batch (grid=1) on single-TC
    # chips; split into 2 grid steps on v7x so both TensorCores are used.
    if batch_tile is None:
        kind = ""
        try:
            kind = jax.devices()[0].device_kind.lower()
        except Exception:
            pass
        NB = -(-N // 2) if ("v7" in kind and N > 1) else N
    else:
        NB = int(batch_tile)
    T = -(-N // NB)                 # grid steps
    Npad = T * NB
    LT = NB * S4                    # per-step lane width (pooled resolution)
    # NOTE: keep LT <= ~2k lanes per step (vreg-file budget); batch_tile controls it.

    # ---- fold each block's two convs (+ BN scales/biases) into one weight/bias ----
    w1_exp = jnp.repeat(w1f, D, axis=0)                                  # (F1D, K1)
    wc1 = (w1_exp[:, :, None] * wdwf[:, None, :]).reshape(F1D, K1 * Chans).astype(bf16)
    bc1 = (b2 + jnp.repeat(b1, D) * wdwf.sum(axis=1)).reshape(F1D, 1).astype(jnp.float32)
    wc2 = (wpf[:, None, :] * wtf.T[None, :, :]).reshape(F2, 16 * F1D).astype(bf16)
    bc2 = (wpf @ b3 + b4).reshape(F2, 1).astype(jnp.float32)

    # Phase-split, pooled-resolution, batch-interleaved lane layout (bf16):
    # x_ph[tile, p*Chans + c, t4*NB + b] = x[tile*NB + b, 0, c, 4*t4 + p]
    xs = x[:, 0].astype(jnp.float32)                                     # (N, Chans, S)
    if Npad != N:
        xs = jnp.concatenate([xs, jnp.zeros((Npad - N, Chans, S), xs.dtype)], 0)
    x_ph = (xs.reshape(T, NB, Chans, S4, 4)
              .transpose(0, 4, 2, 3, 1)
              .reshape(T, 4 * Chans, LT)
              .astype(bf16))

    kernel = functools.partial(_eegnet_kernel, Chans, K1, NB)

    out = pl.pallas_call(
        kernel,
        out_shape=jax.ShapeDtypeStruct((T, F2, LT), jnp.float32),
        grid_spec=pltpu.PrefetchScalarGridSpec(
            num_scalar_prefetch=0,
            grid=(T,),
            in_specs=[
                pl.BlockSpec((None, 4 * Chans, LT), lambda b: (b, 0, 0)),  # x (bf16)
                pl.BlockSpec((F1D, K1 * Chans), lambda b: (0, 0)),         # wc1
                pl.BlockSpec((F1D, 1), lambda b: (0, 0)),                  # bc1
                pl.BlockSpec((F2, 16 * F1D), lambda b: (0, 0)),            # wc2
                pl.BlockSpec((F2, 1), lambda b: (0, 0)),                   # bc2
            ],
            out_specs=pl.BlockSpec((None, F2, LT), lambda b: (b, 0, 0)),
        ),
        compiler_params=pltpu.CompilerParams(
            dimension_semantics=("parallel",),          # 2 TCs on v7x when T > 1
            vmem_limit_bytes=48 * 1024 * 1024),         # < v7x 64 MiB, > default 16/32
    )(x_ph, wc1, bc1, wc2, bc2)

    # Kernel output is (tile, F2, t4*NB + b) post-ELU, pre-pool8.
    # Final AvgPool(1,8) + batch reshape done here in plain XLA (f32, exact).
    y4 = out.reshape(T, F2, S4, NB).transpose(0, 3, 1, 2).reshape(Npad, F2, S4)
    y = y4.reshape(Npad, F2, S32, 8).mean(-1).reshape(Npad, F2 * S32)
    return y[:N]


def init_params(key, Chans, kernLenght, F1, D, F2):
    """Deterministic synthetic parameters; BN (eval mode) folded into conv weights."""
    F1D = F1 * D
    ks = jax.random.split(key, 20)

    def nrm(k, shape, scale=0.1):
        return (scale * jax.random.normal(k, shape)).astype(jnp.float32)

    w1 = nrm(ks[0], (F1, kernLenght))        # Conv2d(1, F1, (1, K1))
    wdw = nrm(ks[1], (F1D, Chans))           # Conv2d(F1, F1*D, (Chans, 1), groups=F1)
    wt = nrm(ks[2], (F1D, 16))               # Conv2d(F1*D, F1*D, (1, 16), groups=F1*D)
    wp = nrm(ks[3], (F2, F1D))               # Conv2d(F1*D, F2, (1, 1))

    def bn_fold(kg, kb, km, kv, C, eps=1e-5):
        gamma = 1.0 + 0.1 * jax.random.normal(kg, (C,))
        beta = 0.1 * jax.random.normal(kb, (C,))
        mean = 0.1 * jax.random.normal(km, (C,))
        var = 1.0 + 0.1 * jnp.abs(jax.random.normal(kv, (C,)))
        s = gamma / jnp.sqrt(var + eps)
        b = beta - mean * s
        return s.astype(jnp.float32), b.astype(jnp.float32)

    s1, b1 = bn_fold(ks[4], ks[5], ks[6], ks[7], F1)
    s2, b2 = bn_fold(ks[8], ks[9], ks[10], ks[11], F1D)
    s3, b3 = bn_fold(ks[12], ks[13], ks[14], ks[15], F1D)
    s4, b4 = bn_fold(ks[16], ks[17], ks[18], ks[19], F2)

    w1f = w1 * s1[:, None]
    wdwf = wdw * s2[:, None]
    wtf = wt * s3[:, None]
    wpf = wp * s4[:, None]
    return (w1f, b1, wdwf, b2, wtf, b3.reshape(F1D, 1), wpf, b4.reshape(F2, 1))


def reference_forward(x, params, *, Chans, Samples, kernLenght, F1, D, F2):
    """Pure-JAX reference (same eval-mode semantics) for correctness checking."""
    w1f, b1, wdwf, b2, wtf, b3, wpf, b4 = params
    N = x.shape[0]
    S, K1, S4, F1D = Samples, kernLenght, Samples // 4, F1 * D
    padL1, padR1 = K1 // 2 - 1, K1 - K1 // 2
    xs = x[:, 0]                                                    # (N, Chans, S)
    xp = jnp.pad(xs, ((0, 0), (0, 0), (padL1, padR1)))
    win = jnp.stack([xp[..., k:k + S] for k in range(K1)], axis=-1)  # (N,C,S,K1)
    y1 = jnp.einsum('fk,ncsk->nfcs', w1f, win) + b1[None, :, None, None]
    wdwr = wdwf.reshape(F1, D, Chans)
    y2 = jnp.einsum('fdc,nfcs->nfds', wdwr, y1).reshape(N, F1D, S) + b2[None, :, None]
    y2 = _elu(y2)
    y2 = y2.reshape(N, F1D, S4, 4).mean(-1)
    y2p = jnp.pad(y2, ((0, 0), (0, 0), (7, 8)))
    win2 = jnp.stack([y2p[..., k:k + S4] for k in range(16)], axis=-1)
    y3 = jnp.einsum('ck,ncsk->ncs', wtf, win2) + b3[None, :, :]
    y4 = jnp.einsum('oc,ncs->nos', wpf, y3) + b4[None, :, :]
    y4 = _elu(y4)
    y4 = y4.reshape(N, F2, S4 // 8, 8).mean(-1)
    return y4.reshape(N, -1)


if __name__ == "__main__":
    # Small EEGNet config (Samples must be divisible by 4*8 = 32 for the pools).
    Chans, Samples, kernLenght, F1, D, F2 = 4, 64, 16, 4, 2, 8

    key = jax.random.PRNGKey(0)
    kx, kp = jax.random.split(key)
    x = jax.random.normal(kx, (2, 1, Chans, Samples), dtype=jnp.float32)
    params = init_params(kp, Chans, kernLenght, F1, D, F2)

    out = eegnet_forward(x, params, Chans=Chans, Samples=Samples,
                         kernLenght=kernLenght, F1=F1, D=D, F2=F2)
    out = jax.block_until_ready(out)

    # High-precision golden reference (kernel uses bf16 MXU operands).
    with jax.default_matmul_precision("float32"):
        ref = reference_forward(x, params, Chans=Chans, Samples=Samples,
                                kernLenght=kernLenght, F1=F1, D=D, F2=F2)

    assert out.shape == (2, F2 * (Samples // 32)), out.shape
    max_err = float(jnp.max(jnp.abs(out - ref)))
    if not bool(jnp.allclose(out, ref, atol=2e-2, rtol=2e-2)):
        raise AssertionError(
            f"Pallas kernel output mismatch vs JAX reference (max abs err {max_err})")
    print("KERNEL_OK")
</pallas_src>

<mosaic_0001>
module attributes {stable_mosaic.version = 11 : i64} {
  func.func @_eegnet_kernel(%arg0: i32, %arg1: memref<1x16x32xbf16, #tpu.memory_space<vmem>>, %arg2: memref<8x64xbf16, #tpu.memory_space<vmem>>, %arg3: memref<8x1xf32, #tpu.memory_space<vmem>>, %arg4: memref<8x128xbf16, #tpu.memory_space<vmem>>, %arg5: memref<8x1xf32, #tpu.memory_space<vmem>>, %arg6: memref<1x8x32xf32, #tpu.memory_space<vmem>>) attributes {dimension_semantics = [#tpu.dimension_semantics<parallel>], iteration_bounds = array<i64: 1>, scalar_prefetch = 0 : i64, scratch_operands = 0 : i64, tpu.core_type = #tpu.core_type<tc>, window_params = [{transform_indices = @transform_0, window_bounds = array<i64: 1, 16, 32>}, {pipeline_mode = #tpu.pipeline_mode<synchronous>, transform_indices = @transform_1, window_bounds = array<i64: 8, 64>}, {pipeline_mode = #tpu.pipeline_mode<synchronous>, transform_indices = @transform_2, window_bounds = array<i64: 8, 1>}, {pipeline_mode = #tpu.pipeline_mode<synchronous>, transform_indices = @transform_3, window_bounds = array<i64: 8, 128>}, {pipeline_mode = #tpu.pipeline_mode<synchronous>, transform_indices = @transform_4, window_bounds = array<i64: 8, 1>}, {transform_indices = @transform_5, window_bounds = array<i64: 1, 8, 32>}]} {
    %c0 = arith.constant 0 : index
    %c0_0 = arith.constant 0 : index
    %c0_1 = arith.constant 0 : index
    %0 = vector.load %arg1[%c0, %c0_0, %c0_1] : memref<1x16x32xbf16, #tpu.memory_space<vmem>>, vector<1x16x32xbf16>
    %1 = vector.shape_cast %0 : vector<1x16x32xbf16> to vector<16x32xbf16>
    %2 = vector.extract_strided_slice %1 {offsets = [4, 0], sizes = [4, 32], strides = [1, 1]} : vector<16x32xbf16> to vector<4x32xbf16>
    %cst = arith.constant 0.000000e+00 : bf16
    %3 = vector.broadcast %cst : bf16 to vector<4x4xbf16>
    %4 = vector.extract_strided_slice %2 {offsets = [0, 0], sizes = [4, 28], strides = [1, 1]} : vector<4x32xbf16> to vector<4x28xbf16>
    %5 = tpu.concatenate %3, %4 in 1 : vector<4x4xbf16>, vector<4x28xbf16> -> vector<4x32xbf16>
    %6 = vector.extract_strided_slice %1 {offsets = [8, 0], sizes = [4, 32], strides = [1, 1]} : vector<16x32xbf16> to vector<4x32xbf16>
    %cst_2 = arith.constant 0.000000e+00 : bf16
    %7 = vector.broadcast %cst_2 : bf16 to vector<4x4xbf16>
    %8 = vector.extract_strided_slice %6 {offsets = [0, 0], sizes = [4, 28], strides = [1, 1]} : vector<4x32xbf16> to vector<4x28xbf16>
    %9 = tpu.concatenate %7, %8 in 1 : vector<4x4xbf16>, vector<4x28xbf16> -> vector<4x32xbf16>
    %10 = vector.extract_strided_slice %1 {offsets = [12, 0], sizes = [4, 32], strides = [1, 1]} : vector<16x32xbf16> to vector<4x32xbf16>
    %cst_3 = arith.constant 0.000000e+00 : bf16
    %11 = vector.broadcast %cst_3 : bf16 to vector<4x4xbf16>
    %12 = vector.extract_strided_slice %10 {offsets = [0, 0], sizes = [4, 28], strides = [1, 1]} : vector<4x32xbf16> to vector<4x28xbf16>
    %13 = tpu.concatenate %11, %12 in 1 : vector<4x4xbf16>, vector<4x28xbf16> -> vector<4x32xbf16>
    %14 = vector.extract_strided_slice %1 {offsets = [0, 0], sizes = [4, 32], strides = [1, 1]} : vector<16x32xbf16> to vector<4x32xbf16>
    %cst_4 = arith.constant 0.000000e+00 : bf16
    %15 = vector.broadcast %cst_4 : bf16 to vector<4x2xbf16>
    %16 = vector.extract_strided_slice %14 {offsets = [0, 0], sizes = [4, 30], strides = [1, 1]} : vector<4x32xbf16> to vector<4x30xbf16>
    %17 = tpu.concatenate %15, %16 in 1 : vector<4x2xbf16>, vector<4x30xbf16> -> vector<4x32xbf16>
    %18 = vector.extract_strided_slice %1 {offsets = [4, 0], sizes = [4, 32], strides = [1, 1]} : vector<16x32xbf16> to vector<4x32xbf16>
    %cst_5 = arith.constant 0.000000e+00 : bf16
    %19 = vector.broadcast %cst_5 : bf16 to vector<4x2xbf16>
    %20 = vector.extract_strided_slice %18 {offsets = [0, 0], sizes = [4, 30], strides = [1, 1]} : vector<4x32xbf16> to vector<4x30xbf16>
    %21 = tpu.concatenate %19, %20 in 1 : vector<4x2xbf16>, vector<4x30xbf16> -> vector<4x32xbf16>
    %22 = vector.extract_strided_slice %1 {offsets = [8, 0], sizes = [4, 32], strides = [1, 1]} : vector<16x32xbf16> to vector<4x32xbf16>
    %cst_6 = arith.constant 0.000000e+00 : bf16
    %23 = vector.broadcast %cst_6 : bf16 to vector<4x2xbf16>
    %24 = vector.extract_strided_slice %22 {offsets = [0, 0], sizes = [4, 30], strides = [1, 1]} : vector<4x32xbf16> to vector<4x30xbf16>
    %25 = tpu.concatenate %23, %24 in 1 : vector<4x2xbf16>, vector<4x30xbf16> -> vector<4x32xbf16>
    %26 = vector.extract_strided_slice %1 {offsets = [12, 0], sizes = [4, 32], strides = [1, 1]} : vector<16x32xbf16> to vector<4x32xbf16>
    %cst_7 = arith.constant 0.000000e+00 : bf16
    %27 = vector.broadcast %cst_7 : bf16 to vector<4x2xbf16>
    %28 = vector.extract_strided_slice %26 {offsets = [0, 0], sizes = [4, 30], strides = [1, 1]} : vector<4x32xbf16> to vector<4x30xbf16>
    %29 = tpu.concatenate %27, %28 in 1 : vector<4x2xbf16>, vector<4x30xbf16> -> vector<4x32xbf16>
    %30 = vector.extract_strided_slice %1 {offsets = [0, 0], sizes = [4, 32], strides = [1, 1]} : vector<16x32xbf16> to vector<4x32xbf16>
    %31 = vector.extract_strided_slice %1 {offsets = [4, 0], sizes = [4, 32], strides = [1, 1]} : vector<16x32xbf16> to vector<4x32xbf16>
    %32 = vector.extract_strided_slice %1 {offsets = [8, 0], sizes = [4, 32], strides = [1, 1]} : vector<16x32xbf16> to vector<4x32xbf16>
    %33 = vector.extract_strided_slice %1 {offsets = [12, 0], sizes = [4, 32], strides = [1, 1]} : vector<16x32xbf16> to vector<4x32xbf16>
    %34 = vector.extract_strided_slice %1 {offsets = [0, 0], sizes = [4, 32], strides = [1, 1]} : vector<16x32xbf16> to vector<4x32xbf16>
    %cst_8 = arith.constant 0.000000e+00 : bf16
    %35 = vector.broadcast %cst_8 : bf16 to vector<4x2xbf16>
    %36 = vector.extract_strided_slice %34 {offsets = [0, 2], sizes = [4, 30], strides = [1, 1]} : vector<4x32xbf16> to vector<4x30xbf16>
    %37 = tpu.concatenate %36, %35 in 1 : vector<4x30xbf16>, vector<4x2xbf16> -> vector<4x32xbf16>
    %38 = vector.extract_strided_slice %1 {offsets = [4, 0], sizes = [4, 32], strides = [1, 1]} : vector<16x32xbf16> to vector<4x32xbf16>
    %cst_9 = arith.constant 0.000000e+00 : bf16
    %39 = vector.broadcast %cst_9 : bf16 to vector<4x2xbf16>
    %40 = vector.extract_strided_slice %38 {offsets = [0, 2], sizes = [4, 30], strides = [1, 1]} : vector<4x32xbf16> to vector<4x30xbf16>
    %41 = tpu.concatenate %40, %39 in 1 : vector<4x30xbf16>, vector<4x2xbf16> -> vector<4x32xbf16>
    %42 = vector.extract_strided_slice %1 {offsets = [8, 0], sizes = [4, 32], strides = [1, 1]} : vector<16x32xbf16> to vector<4x32xbf16>
    %cst_10 = arith.constant 0.000000e+00 : bf16
    %43 = vector.broadcast %cst_10 : bf16 to vector<4x2xbf16>
    %44 = vector.extract_strided_slice %42 {offsets = [0, 2], sizes = [4, 30], strides = [1, 1]} : vector<4x32xbf16> to vector<4x30xbf16>
    %45 = tpu.concatenate %44, %43 in 1 : vector<4x30xbf16>, vector<4x2xbf16> -> vector<4x32xbf16>
    %46 = vector.extract_strided_slice %1 {offsets = [12, 0], sizes = [4, 32], strides = [1, 1]} : vector<16x32xbf16> to vector<4x32xbf16>
    %cst_11 = arith.constant 0.000000e+00 : bf16
    %47 = vector.broadcast %cst_11 : bf16 to vector<4x2xbf16>
    %48 = vector.extract_strided_slice %46 {offsets = [0, 2], sizes = [4, 30], strides = [1, 1]} : vector<4x32xbf16> to vector<4x30xbf16>
    %49 = tpu.concatenate %48, %47 in 1 : vector<4x30xbf16>, vector<4x2xbf16> -> vector<4x32xbf16>
    %50 = vector.extract_strided_slice %1 {offsets = [0, 0], sizes = [4, 32], strides = [1, 1]} : vector<16x32xbf16> to vector<4x32xbf16>
    %cst_12 = arith.constant 0.000000e+00 : bf16
    %51 = vector.broadcast %cst_12 : bf16 to vector<4x4xbf16>
    %52 = vector.extract_strided_slice %50 {offsets = [0, 4], sizes = [4, 28], strides = [1, 1]} : vector<4x32xbf16> to vector<4x28xbf16>
    %53 = tpu.concatenate %52, %51 in 1 : vector<4x28xbf16>, vector<4x4xbf16> -> vector<4x32xbf16>
    %54 = vector.extract_strided_slice %1 {offsets = [4, 0], sizes = [4, 32], strides = [1, 1]} : vector<16x32xbf16> to vector<4x32xbf16>
    %cst_13 = arith.constant 0.000000e+00 : bf16
    %55 = vector.broadcast %cst_13 : bf16 to vector<4x4xbf16>
    %56 = vector.extract_strided_slice %54 {offsets = [0, 4], sizes = [4, 28], strides = [1, 1]} : vector<4x32xbf16> to vector<4x28xbf16>
    %57 = tpu.concatenate %56, %55 in 1 : vector<4x28xbf16>, vector<4x4xbf16> -> vector<4x32xbf16>
    %58 = vector.extract_strided_slice %1 {offsets = [8, 0], sizes = [4, 32], strides = [1, 1]} : vector<16x32xbf16> to vector<4x32xbf16>
    %cst_14 = arith.constant 0.000000e+00 : bf16
    %59 = vector.broadcast %cst_14 : bf16 to vector<4x4xbf16>
    %60 = vector.extract_strided_slice %58 {offsets = [0, 4], sizes = [4, 28], strides = [1, 1]} : vector<4x32xbf16> to vector<4x28xbf16>
    %61 = tpu.concatenate %60, %59 in 1 : vector<4x28xbf16>, vector<4x4xbf16> -> vector<4x32xbf16>
    %62 = vector.extract_strided_slice %1 {offsets = [12, 0], sizes = [4, 32], strides = [1, 1]} : vector<16x32xbf16> to vector<4x32xbf16>
    %cst_15 = arith.constant 0.000000e+00 : bf16
    %63 = vector.broadcast %cst_15 : bf16 to vector<4x4xbf16>
    %64 = vector.extract_strided_slice %62 {offsets = [0, 4], sizes = [4, 28], strides = [1, 1]} : vector<4x32xbf16> to vector<4x28xbf16>
    %65 = tpu.concatenate %64, %63 in 1 : vector<4x28xbf16>, vector<4x4xbf16> -> vector<4x32xbf16>
    %66 = tpu.concatenate %5, %9, %13, %17, %21, %25, %29, %30, %31, %32, %33, %37, %41, %45, %49, %53 in 0 : vector<4x32xbf16>, vector<4x32xbf16>, vector<4x32xbf16>, vector<4x32xbf16>, vector<4x32xbf16>, vector<4x32xbf16>, vector<4x32xbf16>, vector<4x32xbf16>, vector<4x32xbf16>, vector<4x32xbf16>, vector<4x32xbf16>, vector<4x32xbf16>, vector<4x32xbf16>, vector<4x32xbf16>, vector<4x32xbf16>, vector<4x32xbf16> -> vector<64x32xbf16>
    %67 = tpu.concatenate %57, %61, %65 in 0 : vector<4x32xbf16>, vector<4x32xbf16>, vector<4x32xbf16> -> vector<12x32xbf16>
    %68 = tpu.concatenate %66, %67 in 0 : vector<64x32xbf16>, vector<12x32xbf16> -> vector<76x32xbf16>
    %69 = vector.extract_strided_slice %68 {offsets = [0, 0], sizes = [64, 32], strides = [1, 1]} : vector<76x32xbf16> to vector<64x32xbf16>
    %70 = vector.extract_strided_slice %68 {offsets = [4, 0], sizes = [64, 32], strides = [1, 1]} : vector<76x32xbf16> to vector<64x32xbf16>
    %71 = vector.extract_strided_slice %68 {offsets = [8, 0], sizes = [64, 32], strides = [1, 1]} : vector<76x32xbf16> to vector<64x32xbf16>
    %72 = vector.extract_strided_slice %68 {offsets = [12, 0], sizes = [64, 32], strides = [1, 1]} : vector<76x32xbf16> to vector<64x32xbf16>
    %73 = tpu.concatenate %69, %70, %71, %72 in 1 : vector<64x32xbf16>, vector<64x32xbf16>, vector<64x32xbf16>, vector<64x32xbf16> -> vector<64x128xbf16>
    %c0_16 = arith.constant 0 : index
    %c0_17 = arith.constant 0 : index
    %74 = vector.load %arg2[%c0_16, %c0_17] : memref<8x64xbf16, #tpu.memory_space<vmem>>, vector<8x64xbf16>
    %cst_18 = arith.constant dense<0.000000e+00> : vector<8x128xf32>
    %75 = tpu.matmul %74, %73, %cst_18 {dimension_numbers = #tpu.dot_dimension_numbers<[1], [0], [0], [1], [0, 0, 1, 1], [], []>} : vector<8x64xbf16>, vector<64x128xbf16>, vector<8x128xf32> -> vector<8x128xf32>
    %c0_19 = arith.constant 0 : index
    %c0_20 = arith.constant 0 : index
    %76 = vector.load %arg3[%c0_19, %c0_20] : memref<8x1xf32, #tpu.memory_space<vmem>>, vector<8x1xf32>
    %77 = vector.broadcast %76 : vector<8x1xf32> to vector<8x128xf32>
    %78 = arith.addf %75, %77 : vector<8x128xf32>
    %cst_21 = arith.constant 0.000000e+00 : f32
    %79 = vector.broadcast %cst_21 : f32 to vector<8x128xf32>
    %80 = arith.cmpf ogt, %78, %79 : vector<8x128xf32>
    %cst_22 = arith.constant 0.000000e+00 : f32
    %81 = vector.broadcast %cst_22 : f32 to vector<8x128xf32>
    %82 = arith.minimumf %78, %81 : vector<8x128xf32>
    %83 = math.exp %82 : vector<8x128xf32>
    %cst_23 = arith.constant 1.000000e+00 : f32
    %84 = vector.broadcast %cst_23 : f32 to vector<8x128xf32>
    %85 = arith.subf %83, %84 : vector<8x128xf32>
    %86 = arith.select %80, %78, %85 : vector<8x128xi1>, vector<8x128xf32>
    %87 = vector.extract_strided_slice %86 {offsets = [0, 0], sizes = [8, 32], strides = [1, 1]} : vector<8x128xf32> to vector<8x32xf32>
    %88 = vector.extract_strided_slice %86 {offsets = [0, 32], sizes = [8, 32], strides = [1, 1]} : vector<8x128xf32> to vector<8x32xf32>
    %89 = arith.addf %87, %88 : vector<8x32xf32>
    %90 = vector.extract_strided_slice %86 {offsets = [0, 64], sizes = [8, 32], strides = [1, 1]} : vector<8x128xf32> to vector<8x32xf32>
    %91 = arith.addf %89, %90 : vector<8x32xf32>
    %92 = vector.extract_strided_slice %86 {offsets = [0, 96], sizes = [8, 32], strides = [1, 1]} : vector<8x128xf32> to vector<8x32xf32>
    %93 = arith.addf %91, %92 : vector<8x32xf32>
    %cst_24 = arith.constant 2.500000e-01 : f32
    %94 = vector.broadcast %cst_24 : f32 to vector<8x32xf32>
    %95 = arith.mulf %94, %93 : vector<8x32xf32>
    %96 = arith.truncf %95 : vector<8x32xf32> to vector<8x32xbf16>
    %cst_25 = arith.constant 0.000000e+00 : bf16
    %97 = vector.broadcast %cst_25 : bf16 to vector<8x14xbf16>
    %98 = vector.extract_strided_slice %96 {offsets = [0, 0], sizes = [8, 18], strides = [1, 1]} : vector<8x32xbf16> to vector<8x18xbf16>
    %99 = tpu.concatenate %97, %98 in 1 : vector<8x14xbf16>, vector<8x18xbf16> -> vector<8x32xbf16>
    %cst_26 = arith.constant 0.000000e+00 : bf16
    %100 = vector.broadcast %cst_26 : bf16 to vector<8x12xbf16>
    %101 = vector.extract_strided_slice %96 {offsets = [0, 0], sizes = [8, 20], strides = [1, 1]} : vector<8x32xbf16> to vector<8x20xbf16>
    %102 = tpu.concatenate %100, %101 in 1 : vector<8x12xbf16>, vector<8x20xbf16> -> vector<8x32xbf16>
    %cst_27 = arith.constant 0.000000e+00 : bf16
    %103 = vector.broadcast %cst_27 : bf16 to vector<8x10xbf16>
    %104 = vector.extract_strided_slice %96 {offsets = [0, 0], sizes = [8, 22], strides = [1, 1]} : vector<8x32xbf16> to vector<8x22xbf16>
    %105 = tpu.concatenate %103, %104 in 1 : vector<8x10xbf16>, vector<8x22xbf16> -> vector<8x32xbf16>
    %cst_28 = arith.constant 0.000000e+00 : bf16
    %106 = vector.broadcast %cst_28 : bf16 to vector<8x8xbf16>
    %107 = vector.extract_strided_slice %96 {offsets = [0, 0], sizes = [8, 24], strides = [1, 1]} : vector<8x32xbf16> to vector<8x24xbf16>
    %108 = tpu.concatenate %106, %107 in 1 : vector<8x8xbf16>, vector<8x24xbf16> -> vector<8x32xbf16>
    %cst_29 = arith.constant 0.000000e+00 : bf16
    %109 = vector.broadcast %cst_29 : bf16 to vector<8x6xbf16>
    %110 = vector.extract_strided_slice %96 {offsets = [0, 0], sizes = [8, 26], strides = [1, 1]} : vector<8x32xbf16> to vector<8x26xbf16>
    %111 = tpu.concatenate %109, %110 in 1 : vector<8x6xbf16>, vector<8x26xbf16> -> vector<8x32xbf16>
    %cst_30 = arith.constant 0.000000e+00 : bf16
    %112 = vector.broadcast %cst_30 : bf16 to vector<8x4xbf16>
    %113 = vector.extract_strided_slice %96 {offsets = [0, 0], sizes = [8, 28], strides = [1, 1]} : vector<8x32xbf16> to vector<8x28xbf16>
    %114 = tpu.concatenate %112, %113 in 1 : vector<8x4xbf16>, vector<8x28xbf16> -> vector<8x32xbf16>
    %cst_31 = arith.constant 0.000000e+00 : bf16
    %115 = vector.broadcast %cst_31 : bf16 to vector<8x2xbf16>
    %116 = vector.extract_strided_slice %96 {offsets = [0, 0], sizes = [8, 30], strides = [1, 1]} : vector<8x32xbf16> to vector<8x30xbf16>
    %117 = tpu.concatenate %115, %116 in 1 : vector<8x2xbf16>, vector<8x30xbf16> -> vector<8x32xbf16>
    %cst_32 = arith.constant 0.000000e+00 : bf16
    %118 = vector.broadcast %cst_32 : bf16 to vector<8x2xbf16>
    %119 = vector.extract_strided_slice %96 {offsets = [0, 2], sizes = [8, 30], strides = [1, 1]} : vector<8x32xbf16> to vector<8x30xbf16>
    %120 = tpu.concatenate %119, %118 in 1 : vector<8x30xbf16>, vector<8x2xbf16> -> vector<8x32xbf16>
    %cst_33 = arith.constant 0.000000e+00 : bf16
    %121 = vector.broadcast %cst_33 : bf16 to vector<8x4xbf16>
    %122 = vector.extract_strided_slice %96 {offsets = [0, 4], sizes = [8, 28], strides = [1, 1]} : vector<8x32xbf16> to vector<8x28xbf16>
    %123 = tpu.concatenate %122, %121 in 1 : vector<8x28xbf16>, vector<8x4xbf16> -> vector<8x32xbf16>
    %cst_34 = arith.constant 0.000000e+00 : bf16
    %124 = vector.broadcast %cst_34 : bf16 to vector<8x6xbf16>
    %125 = vector.extract_strided_slice %96 {offsets = [0, 6], sizes = [8, 26], strides = [1, 1]} : vector<8x32xbf16> to vector<8x26xbf16>
    %126 = tpu.concatenate %125, %124 in 1 : vector<8x26xbf16>, vector<8x6xbf16> -> vector<8x32xbf16>
    %cst_35 = arith.constant 0.000000e+00 : bf16
    %127 = vector.broadcast %cst_35 : bf16 to vector<8x8xbf16>
    %128 = vector.extract_strided_slice %96 {offsets = [0, 8], sizes = [8, 24], strides = [1, 1]} : vector<8x32xbf16> to vector<8x24xbf16>
    %129 = tpu.concatenate %128, %127 in 1 : vector<8x24xbf16>, vector<8x8xbf16> -> vector<8x32xbf16>
    %cst_36 = arith.constant 0.000000e+00 : bf16
    %130 = vector.broadcast %cst_36 : bf16 to vector<8x10xbf16>
    %131 = vector.extract_strided_slice %96 {offsets = [0, 10], sizes = [8, 22], strides = [1, 1]} : vector<8x32xbf16> to vector<8x22xbf16>
    %132 = tpu.concatenate %131, %130 in 1 : vector<8x22xbf16>, vector<8x10xbf16> -> vector<8x32xbf16>
    %cst_37 = arith.constant 0.000000e+00 : bf16
    %133 = vector.broadcast %cst_37 : bf16 to vector<8x12xbf16>
    %134 = vector.extract_strided_slice %96 {offsets = [0, 12], sizes = [8, 20], strides = [1, 1]} : vector<8x32xbf16> to vector<8x20xbf16>
    %135 = tpu.concatenate %134, %133 in 1 : vector<8x20xbf16>, vector<8x12xbf16> -> vector<8x32xbf16>
    %cst_38 = arith.constant 0.000000e+00 : bf16
    %136 = vector.broadcast %cst_38 : bf16 to vector<8x14xbf16>
    %137 = vector.extract_strided_slice %96 {offsets = [0, 14], sizes = [8, 18], strides = [1, 1]} : vector<8x32xbf16> to vector<8x18xbf16>
    %138 = tpu.concatenate %137, %136 in 1 : vector<8x18xbf16>, vector<8x14xbf16> -> vector<8x32xbf16>
    %cst_39 = arith.constant 0.000000e+00 : bf16
    %139 = vector.broadcast %cst_39 : bf16 to vector<8x16xbf16>
    %140 = vector.extract_strided_slice %96 {offsets = [0, 16], sizes = [8, 16], strides = [1, 1]} : vector<8x32xbf16> to vector<8x16xbf16>
    %141 = tpu.concatenate %140, %139 in 1 : vector<8x16xbf16>, vector<8x16xbf16> -> vector<8x32xbf16>
    %142 = tpu.concatenate %99, %102, %105, %108, %111, %114, %117, %96, %120, %123, %126, %129, %132, %135, %138, %141 in 0 : vector<8x32xbf16>, vector<8x32xbf16>, vector<8x32xbf16>, vector<8x32xbf16>, vector<8x32xbf16>, vector<8x32xbf16>, vector<8x32xbf16>, vector<8x32xbf16>, vector<8x32xbf16>, vector<8x32xbf16>, vector<8x32xbf16>, vector<8x32xbf16>, vector<8x32xbf16>, vector<8x32xbf16>, vector<8x32xbf16>, vector<8x32xbf16> -> vector<128x32xbf16>
    %c0_40 = arith.constant 0 : index
    %c0_41 = arith.constant 0 : index
    %143 = vector.load %arg4[%c0_40, %c0_41] : memref<8x128xbf16, #tpu.memory_space<vmem>>, vector<8x128xbf16>
    %cst_42 = arith.constant dense<0.000000e+00> : vector<8x32xf32>
    %144 = tpu.matmul %143, %142, %cst_42 {dimension_numbers = #tpu.dot_dimension_numbers<[1], [0], [0], [1], [0, 0, 1, 1], [], []>} : vector<8x128xbf16>, vector<128x32xbf16>, vector<8x32xf32> -> vector<8x32xf32>
    %c0_43 = arith.constant 0 : index
    %c0_44 = arith.constant 0 : index
    %145 = vector.load %arg5[%c0_43, %c0_44] : memref<8x1xf32, #tpu.memory_space<vmem>>, vector<8x1xf32>
    %146 = vector.broadcast %145 : vector<8x1xf32> to vector<8x32xf32>
    %147 = arith.addf %144, %146 : vector<8x32xf32>
    %cst_45 = arith.constant 0.000000e+00 : f32
    %148 = vector.broadcast %cst_45 : f32 to vector<8x32xf32>
    %149 = arith.cmpf ogt, %147, %148 : vector<8x32xf32>
    %cst_46 = arith.constant 0.000000e+00 : f32
    %150 = vector.broadcast %cst_46 : f32 to vector<8x32xf32>
    %151 = arith.minimumf %147, %150 : vector<8x32xf32>
    %152 = math.exp %151 : vector<8x32xf32>
    %cst_47 = arith.constant 1.000000e+00 : f32
    %153 = vector.broadcast %cst_47 : f32 to vector<8x32xf32>
    %154 = arith.subf %152, %153 : vector<8x32xf32>
    %155 = arith.select %149, %147, %154 : vector<8x32xi1>, vector<8x32xf32>
    %c0_48 = arith.constant 0 : index
    %c0_49 = arith.constant 0 : index
    %c0_50 = arith.constant 0 : index
    %156 = vector.load %arg6[%c0_48, %c0_49, %c0_50] : memref<1x8x32xf32, #tpu.memory_space<vmem>>, vector<1x8x32xf32>
    %157 = vector.shape_cast %156 : vector<1x8x32xf32> to vector<8x32xf32>
    %158 = vector.shape_cast %155 : vector<8x32xf32> to vector<1x8x32xf32>
    tpu.vector_store %arg6[%c0_48, %c0_49, %c0_50], %158 {strides = array<i32>} : memref<1x8x32xf32, #tpu.memory_space<vmem>>, vector<1x8x32xf32>,
    return
  }
  func.func @transform_0(%arg0: i32) -> (i32, i32, i32) {
    %c0_i32 = arith.constant 0 : i32
    %c0_i32_0 = arith.constant 0 : i32
    %c0_i32_1 = arith.constant 0 : i32
    return %arg0, %c0_i32, %c0_i32_0 : i32, i32, i32
  }
  func.func @transform_1(%arg0: i32) -> (i32, i32) {
    %c0_i32 = arith.constant 0 : i32
    %c0_i32_0 = arith.constant 0 : i32
    %c0_i32_1 = arith.constant 0 : i32
    return %c0_i32, %c0_i32_0 : i32, i32
  }
  func.func @transform_2(%arg0: i32) -> (i32, i32) {
    %c0_i32 = arith.constant 0 : i32
    %c0_i32_0 = arith.constant 0 : i32
    %c0_i32_1 = arith.constant 0 : i32
    return %c0_i32, %c0_i32_0 : i32, i32
  }
  func.func @transform_3(%arg0: i32) -> (i32, i32) {
    %c0_i32 = arith.constant 0 : i32
    %c0_i32_0 = arith.constant 0 : i32
    %c0_i32_1 = arith.constant 0 : i32
    return %c0_i32, %c0_i32_0 : i32, i32
  }
  func.func @transform_4(%arg0: i32) -> (i32, i32) {
    %c0_i32 = arith.constant 0 : i32
    %c0_i32_0 = arith.constant 0 : i32
    %c0_i32_1 = arith.constant 0 : i32
    return %c0_i32, %c0_i32_0 : i32, i32
  }
  func.func @transform_5(%arg0: i32) -> (i32, i32, i32) {
    %c0_i32 = arith.constant 0 : i32
    %c0_i32_0 = arith.constant 0 : i32
    %c0_i32_1 = arith.constant 0 : i32
    return %arg0, %c0_i32, %c0_i32_0 : i32, i32, i32
  }
}

</mosaic_0001>

<bundles_post_ra>
// kernel: tpu_custom_call.1
= control target key start
LH: loop header
LB: loop body
LE: loop exit
PB: predicated region body
PF: predicated region fallthrough
CT: control target
= control target key end

     0   :  { %s571_s20 = smov 124   ;;  %s572_s21 = smov 126   ;;  %s793_s0 = inlined_call_operand.vmem [shape: bf16[1,16,32], index: 0, kind: input, shape index: {}]   ;;  %s794_s1 = inlined_call_operand.vmem [shape: bf16[8,64], index: 1, kind: input, shape index: {}]   ;;  %s795_s2 = inlined_call_operand.vmem [shape: f32[8,1], index: 2, kind: input, shape index: {}]   ;;  %s796_s3 = inlined_call_operand.vmem [shape: bf16[8,128], index: 3, kind: input, shape index: {}]   ;;  %s797_s4 = inlined_call_operand.vmem [shape: f32[8,1], index: 4, kind: input, shape index: {}]   ;;  %s798_s5 = inlined_call_operand.hbm [shape: f32[1,8,32], index: 5, kind: output, shape index: {}]  }
   0x1   :  { %v543_v0 = vld [vmem:[%s793_s0] ss:$0 sps:$4 sm:$0xff]   ;;  %v544_v1 = vld [vmem:[%s793_s0 + $0x4] ss:$0 sps:$4 sm:$0xff]  }
   0x2   :  { %72 = vrot.lane.b32.xlu1 %v543_v0, %s571_s20  ;;  %63 = vrot.lane.b32.xlu0 %v543_v0, %s572_s21 }
   0x3   :  { %10 = vsyncpa [#allocation3], 0  ;;  %v41_v2 = vrot.slane %v544_v1, 2  ;;  %s573_s24 = smov 2   ;;  %v635_v3 = vrot.slane %v543_v0, 2  ;;  %s574_s25 = smov 4  }
   0x4   :  { %vm74_vm0 = vcmask 228352   ;;  %vm65_vm1 = vcmask 244736   ;;  %v91_v6 = vrot.slane %v544_v1, 6  ;;  %vm98_vm2 = vcmask 1041408   ;;  %s576_s0 = smov 32   ;;  %s577_s26 = smov 64  }
   0x5   :  { %vm101_vm3 = vcmask 1043456   ;;  %vm48_vm4 = vcmask 15360   ;;  %v575_v18 = vmov 0.0   ;;  %vm104_vm5 = vcmask 1045504   ;;  %s578_s27 = smov 96   ;;  %s582_s6 = smov 112  }
   0x6   :  { %77 = vrot.lane.b32.xlu1 %v544_v1, %s571_s20  ;;  %68 = vrot.lane.b32.xlu0 %v544_v1, %s572_s21  ;;  %v114_v12 = vsel %vm98_vm2, %v635_v3, %v91_v6  ;;  %vm30_vm6 = vcmask 31744   ;;  %vm579_vm7 = vmmov 0   ;;  %vm187_vm8 = vcmask 261120   ;;  %s583_s7 = smov 118   ;;  %s584_s8 = smov 116  }
   0x7   :  { %487 = vmatprep.subr.bf16.mxu0 %v575_v18  ;;  %499 = vmatprep.subr.bf16.mxu1 %v575_v18  ;;  %v115_v19 = vsel %vm101_vm3, %v114_v12, %v91_v6  ;;  %vm196_vm9 = vcmask 523264   ;;  %vm205_vm10 = vcmask 785408   ;;  %s585_s9 = smov 122   ;;  %s586_s10 = smov 120   ;;  %vm358_vm12 = vcmask 130048  }
   0x8   :  { %495 = vmatprep.mubr.msk.bf16.mxu0 %vm579_vm7, %v575_v18  ;;  %515 = vmatprep.mubr.msk.bf16.mxu1 %vm579_vm7, %v575_v18  ;;  %s587_s11 = smov 8   ;;  %s588_s12 = smov 6   ;;  %vm353_vm13 = vcmask 146432   ;;  %vm348_vm14 = vcmask 162816   ;;  %vm343_vm15 = vcmask 179200   ;;  %vm312_vm7 = vcmask 48128  }
   0x9   :  { %s589_s13 = smov 12   ;;  %s590_s14 = smov 10  }
   0xa   :  { %55 = vrot.lane.b32.xlu0 %v544_v1, %s573_s24  ;;  %59 = vrot.lane.b32.xlu1 %v41_v2, %s573_s24  ;;  %s591_s17 = smov 14   ;;  %s592_s19 = smov [#allocation2]  }
   0xe   :  { %51 = vrot.lane.b32.xlu0 %v635_v3, %s573_s24  ;;  %37 = vrot.lane.b32.xlu1 %v544_v1, %s574_s25 }
  0x12   :  { %42 = vrot.lane.b32.xlu0 %v41_v2, %s574_s25  ;;  %28 = vrot.lane.b32.xlu1 %v635_v3, %s574_s25 }
  0x16   :  { %46 = vrot.lane.b32.xlu0 %v543_v0, %s573_s24 }
  0x74   :  { %v73_v4 = vpop.permute.xlu1 %72  ;;  %v64_v5 = vpop.permute.xlu0 %63 }
  0x75   :  { %v76_v7 = vsel %vm74_vm0, %v73_v4, 0  ;;  %v67_v8 = vsel %vm65_vm1, %v64_v5, 0 }
  0x76   :  { %v97_v11 = vrot.slane %v76_v7, 2  ;;  %v93_v15 = vrot.slane %v67_v8, 2  ;;  %v580_v8 = vmov 0  }
  0x77   :  { %541 = vset.pattern.permute.xlu1 %v580_v8  ;;  %542 = vset.pattern.permute.xlu0 %v580_v8 }
  0x78   :  { %v78_v9 = vpop.permute.xlu1 %77  ;;  %v69_v10 = vpop.permute.xlu0 %68  ;;  %v665_v35 = vsel %vm104_vm5, %v115_v19, %v93_v15 }
  0x79   :  { %v80_v13 = vsel %vm74_vm0, %v78_v9, 0  ;;  %v71_v14 = vsel %vm65_vm1, %v69_v10, 0  ;;  %v137_v47 = vrot.slane %v665_v35, 2  ;;  %v155_v50 = vrot.slane %v665_v35, 4 }
  0x7a   :  { %v124_v16 = vrot.slane %v80_v13, 6  ;;  %v95_v17 = vrot.slane %v71_v14, 6  ;;  %v173_v58 = vrot.slane %v665_v35, 6 }
  0x7c   :  { %v126_v20 = vsel %vm98_vm2, %v97_v11, %v124_v16  ;;  %v119_v21 = vsel %vm98_vm2, %v93_v15, %v95_v17  ;;  %v56_v22 = vpop.permute.xlu0 %55  ;;  %v60_v23 = vpop.permute.xlu1 %59  ;;  %v219_v15 = vld [vmem:[%s795_s2] sm:$0xff] }
  0x7d   :  { %v127_v24 = vsel %vm101_vm3, %v126_v20, %v124_v16  ;;  %v120_v25 = vsel %vm101_vm3, %v119_v21, %v95_v17  ;;  %v58_v26 = vsel %vm48_vm4, 0, %v56_v22  ;;  %v62_v27 = vsel %vm48_vm4, 0, %v60_v23 }
  0x7e   :  { %v660_v28 = vsel %vm104_vm5, %v120_v25, %v97_v11  ;;  %v88_v29 = vrot.slane %v58_v26, 6  ;;  %v141_v30 = vrot.slane %v127_v24, 2  ;;  %v90_v31 = vrot.slane %v62_v27, 4 }
  0x7f   :  { %v139_v32 = vrot.slane %v660_v28, 2  ;;  %v157_v33 = vrot.slane %v660_v28, 4  ;;  %v159_v34 = vrot.slane %v127_v24, 4  ;;  %v175_v38 = vrot.slane %v660_v28, 6 }
  0x80   :  { %v52_v36 = vpop.permute.xlu0 %51  ;;  %v38_v37 = vpop.permute.xlu1 %37  ;;  %v177_v39 = vrot.slane %v127_v24, 6 }
  0x81   :  { %v54_v40 = vsel %vm48_vm4, 0, %v52_v36  ;;  %v142_v41 = vsel %vm104_vm5, %v139_v32, %v141_v30  ;;  %v160_v42 = vsel %vm101_vm3, %v157_v33, %v159_v34  ;;  %v40_v43 = vsel %vm30_vm6, 0, %v38_v37 }
  0x82   :  { %v108_v44 = vsel %vm98_vm2, %v54_v40, %v88_v29  ;;  %149 = vrot.lane.b32.xlu1 %v142_v41, %s576_s0  ;;  %167 = vrot.lane.b32.xlu0 %v160_v42, %s577_s26  ;;  %v82_v45 = vrot.slane %v40_v43, 6  ;;  %v178_v52 = vsel %vm98_vm2, %v175_v38, %v177_v39  ;;  %v140_v53 = vsel %vm104_vm5, %v137_v47, %v139_v32  ;;  %v218_v41 = vld [vmem:[%s794_s1] sm:$0xf]  ;;  %s581_s1 = smov 114  }
  0x83   :  { %v110_v46 = vsel %vm101_vm3, %v108_v44, %v90_v31  ;;  %v158_v60 = vsel %vm101_vm3, %v155_v50, %v157_v33  ;;  %v176_v61 = vsel %vm98_vm2, %v173_v58, %v175_v38 }
  0x84   :  { %v43_v48 = vpop.permute.xlu0 %42  ;;  %v29_v49 = vpop.permute.xlu1 %28  ;;  %v684_v55 = vsel %vm104_vm5, %v110_v46, %v635_v3 }
  0x85   :  { %v45_v51 = vsel %vm30_vm6, 0, %v43_v48  ;;  %v33_v54 = vsel %vm30_vm6, 0, %v29_v49  ;;  %v153_v0 = vrot.slane %v684_v55, 4  ;;  %v135_v1 = vrot.slane %v684_v55, 2 }
  0x86   :  { %v84_v56 = vrot.slane %v45_v51, 4  ;;  %185 = vrot.lane.b32.xlu1 %v178_v52, %s578_s27  ;;  %147 = vrot.lane.b32.xlu0 %v140_v53, %s576_s0  ;;  %v100_v57 = vsel %vm98_vm2, %v33_v54, %v82_v45  ;;  %v171_v7 = vrot.slane %v684_v55, 6 }
  0x87   :  { %v156_v4 = vsel %vm101_vm3, %v153_v0, %v155_v50  ;;  %v138_v5 = vsel %vm104_vm5, %v135_v1, %v137_v47 }
  0x88   :  { %v47_v59 = vpop.permute.xlu0 %46  ;;  %v103_v62 = vsel %vm101_vm3, %v100_v57, %v84_v56  ;;  %v174_v10 = vsel %vm98_vm2, %v171_v7, %v173_v58 }
  0x89   :  { %v50_v63 = vsel %vm48_vm4, 0, %v47_v59 }
  0x8a   :  { %v86_v2 = vrot.slane %v50_v63, 2  ;;  %165 = vrot.lane.b32.xlu1 %v158_v60, %s577_s26  ;;  %183 = vrot.lane.b32.xlu0 %v176_v61, %s578_s27  ;;  %v401_v61 = vld [vmem:[%s797_s4] sm:$0xff] }
  0x8c   :  { %v106_v3 = vsel %vm104_vm5, %v103_v62, %v86_v2 }
  0x8d   :  { %v134_v6 = vrot.slane %v106_v3, 2  ;;  %v170_v11 = vrot.slane %v106_v3, 6  ;;  %v152_v12 = vrot.slane %v106_v3, 4 }
  0x8e   :  { %163 = vrot.lane.b32.xlu0 %v156_v4, %s577_s26  ;;  %145 = vrot.lane.b32.xlu1 %v138_v5, %s576_s0 }
  0x8f   :  { %v136_v9 = vsel %vm104_vm5, %v134_v6, %v135_v1  ;;  %v172_v13 = vsel %vm98_vm2, %v170_v11, %v171_v7  ;;  %v154_v14 = vsel %vm101_vm3, %v152_v12, %v153_v0  ;;  %vm338_vm2 = vcmask 195584  }
  0x90   :  { %vm333_vm5 = vcmask 211968  }
  0x92   :  { %143 = vrot.lane.b32.xlu0 %v136_v9, %s576_s0  ;;  %181 = vrot.lane.b32.xlu1 %v174_v10, %s578_s27 }
  0x96   :  { %179 = vrot.lane.b32.xlu0 %v172_v13, %s578_s27  ;;  %161 = vrot.lane.b32.xlu1 %v154_v14, %s577_s26 }
  0x9a   :  { %222 = vperm.xlu1 %541, %v219_v15  }
  0xf4   :  { %v150_v16 = vpop.permute.xlu1 %149  ;;  %v168_v17 = vpop.permute.xlu0 %167 }
  0xf5   :  { %v195_v19 = vsel %vm187_vm8, %v660_v28, %v150_v16 }
  0xf6   :  { %v204_v20 = vsel %vm196_vm9, %v195_v19, %v168_v17 }
  0xf8   :  { %v186_v21 = vpop.permute.xlu1 %185  ;;  %v148_v22 = vpop.permute.xlu0 %147 }
  0xf9   :  { %v216_v23 = vsel %vm205_vm10, %v204_v20, %v186_v21  ;;  %v193_v24 = vsel %vm187_vm8, %v665_v35, %v148_v22 }
  0xfa   :  { %488 = vmatpush3.bf16.msra.mxu0 %v216_v23 }
  0xfb   :  { %489 = vmatprep.subr.bf16.mxu0 %v575_v18 }
  0xfc   :  { %v166_v25 = vpop.permute.xlu1 %165  ;;  %v184_v26 = vpop.permute.xlu0 %183 }
  0xfd   :  { %v202_v27 = vsel %vm196_vm9, %v193_v24, %v166_v25 }
  0xfe   :  { %v213_v28 = vsel %vm205_vm10, %v202_v27, %v184_v26 }
  0xff   :  { %490 = vmatpush3.bf16.msra.mxu0 %v213_v28 }
 0x100   :  { %v164_v29 = vpop.permute.xlu0 %163  ;;  %v146_v30 = vpop.permute.xlu1 %145  ;;  %491 = vmatprep.subr.bf16.mxu0 %v575_v18 }
 0x101   :  { %v191_v31 = vsel %vm187_vm8, %v684_v55, %v146_v30 }
 0x102   :  { %v200_v34 = vsel %vm196_vm9, %v191_v31, %v164_v29 }
 0x104   :  { %v144_v32 = vpop.permute.xlu0 %143  ;;  %v182_v33 = vpop.permute.xlu1 %181 }
 0x105   :  { %v210_v35 = vsel %vm205_vm10, %v200_v34, %v182_v33  ;;  %v189_v36 = vsel %vm187_vm8, %v106_v3, %v144_v32 }
 0x106   :  { %492 = vmatpush3.bf16.msra.mxu0 %v210_v35 }
 0x107   :  { %493 = vmatprep.subr.bf16.mxu0 %v575_v18 }
 0x108   :  { %v180_v37 = vpop.permute.xlu0 %179  ;;  %v162_v38 = vpop.permute.xlu1 %161 }
 0x109   :  { %v198_v39 = vsel %vm196_vm9, %v189_v36, %v162_v38 }
 0x10a   :  { %v207_v40 = vsel %vm205_vm10, %v198_v39, %v180_v37 }
 0x10b   :  { %494 = vmatpush3.bf16.msra.mxu0 %v207_v40 }
 0x10e   :  { %496 = vmatmul.mubr.msk.bf16.vlgmr.msra.gmra.mxu0 %vm196_vm9, %v218_v41 }
 0x115   :  { %v223_v42 = vpop.permute.xlu1 %222 }
 0x1ce   :  { %v262_v43 = vpop.f32.mrf.mxu0 }
 0x1cf   :  { %v263_v44 = vadd.f32 %v262_v43, %v223_v42 }
 0x1d0   :  { %v497_v45 = vpop.f32.mrf.mxu0 }
 0x1d1   :  { %v269_v46 = vmin.f32 %v263_v44, 0.0  ;;  %vm268_vm11 = vcmp.gt.f32.partialorder %v263_v44, 0.0  ;;  %v400_v45 = vld [vmem:[%s796_s3] sm:$0xf] }
 0x1d2   :  { %v265_v47 = vpop.f32.mrf.mxu0 }
 0x1d3   :  { %v270_v48 = vmul.f32 1.442695, %v269_v46 }
 0x1d4   :  { %v498_v49 = vpop.f32.mrf.mxu0 }
 0x1d5   :  { %545 = vpow2.f32 %v270_v48 }
 0x1e2   :  { %v546_v50 = vpop.eup %545 }
 0x1e3   :  { %v471_v51 = vadd.f32 -1.0, %v546_v50 }
 0x1e5   :  { %v273_v52 = vsel %vm268_vm11, %v263_v44, %v471_v51 }
 0x1e6   :  { %279 = vrot.lane.b32.xlu1 %v273_v52, %s577_s26  ;;  %275 = vrot.lane.b32.xlu0 %v273_v52, %s578_s27 }
 0x1ea   :  { %283 = vrot.lane.b32.xlu0 %v273_v52, %s576_s0 }
 0x258   :  { %v276_v53 = vpop.permute.xlu0 %275  ;;  %v280_v55 = vpop.permute.xlu1 %279 }
 0x259   :  { %v278_v54 = vadd.f32 %v276_v53, %v273_v52 }
 0x25b   :  { %v282_v56 = vadd.f32 %v280_v55, %v278_v54 }
 0x25c   :  { %v284_v57 = vpop.permute.xlu0 %283 }
 0x25d   :  { %v286_v58 = vadd.f32 %v284_v57, %v282_v56 }
 0x25f   :  { %v287_v59 = vmul.f32 0.25, %v286_v58 }
 0x261   :  { %v742_v60 = vpack.c.bf16 %v287_v59, %v287_v59 }
 0x263   :  { %351 = vrot.lane.b32.xlu0 %v742_v60, %s581_s1  ;;  %356 = vrot.lane.b32.xlu1 %v742_v60, %s582_s6  ;;  %v367_v26 = vrot.slane %v742_v60, 4 }
 0x267   :  { %341 = vrot.lane.b32.xlu0 %v742_v60, %s583_s7  ;;  %346 = vrot.lane.b32.xlu1 %v742_v60, %s584_s8 }
 0x26b   :  { %331 = vrot.lane.b32.xlu0 %v742_v60, %s585_s9  ;;  %336 = vrot.lane.b32.xlu1 %v742_v60, %s586_s10 }
 0x26f   :  { %323 = vrot.lane.b32.xlu0 %v742_v60, %s572_s21  ;;  %327 = vrot.lane.b32.xlu1 %v742_v60, %s571_s20  ;;  %s460_s20 = sshll.u32 %s592_s19, 4  ;;  %s461_s20 = int_to_ptr.vmem [resolvable:$true] %s460_s20 }
 0x270   :  { %s549_s3 = scalar_lea.vmem %s461_s20, 128  ;;  %p554_p1 = scmp.lt.s32.totalorder %s461_s20, %s461_s20 }
 0x271   :  { %p550_p0 = scmp.ne.s32.totalorder %s461_s20, %s549_s3  ;;  %p555_p2 = scmp.lt.s32.totalorder %s549_s3, %s549_s3 }
 0x273   :  { %315 = vrot.lane.b32.xlu0 %v742_v60, %s574_s25  ;;  %319 = vrot.lane.b32.xlu1 %v742_v60, %s573_s24  ;;  %p556_p3 = por %p555_p2, %p554_p1 }
 0x275   :  { %p557_p4 = pnand %p556_p3, %p550_p0 }
 0x277   :  { %305 = vrot.lane.b32.xlu0 %v742_v60, %s587_s11  ;;  %310 = vrot.lane.b32.xlu1 %v742_v60, %s588_s12 }
 0x27b   :  { %295 = vrot.lane.b32.xlu0 %v742_v60, %s589_s13  ;;  %300 = vrot.lane.b32.xlu1 %v742_v60, %s590_s14 }
 0x27f   :  { %290 = vrot.lane.b32.xlu1 %v742_v60, %s591_s17  ;;  %404 = vperm.xlu0 %542, %v401_v61  }
 0x2d5   :  { %v352_v62 = vpop.permute.xlu0 %351  ;;  %v357_v63 = vpop.permute.xlu1 %356 }
 0x2d6   :  { %v360_v0 = vsel %vm358_vm12, %v357_v63, 0  ;;  %v355_v2 = vsel %vm353_vm13, %v352_v62, 0 }
 0x2d7   :  { %v375_v1 = vrot.slane %v360_v0, 4 }
 0x2d9   :  { %v342_v3 = vpop.permute.xlu0 %341  ;;  %v347_v4 = vpop.permute.xlu1 %346  ;;  %v398_v5 = vsel %vm101_vm3, %v355_v2, %v375_v1 }
 0x2da   :  { %v350_v6 = vsel %vm348_vm14, %v347_v4, 0  ;;  %500 = vmatpush3.bf16.msra.mxu1 %v398_v5  ;;  %v345_v8 = vsel %vm343_vm15, %v342_v3, 0 }
 0x2db   :  { %v373_v7 = vrot.slane %v350_v6, 4  ;;  %501 = vmatprep.subr.bf16.mxu1 %v575_v18 }
 0x2dd   :  { %v332_v9 = vpop.permute.xlu0 %331  ;;  %v337_v10 = vpop.permute.xlu1 %336  ;;  %v395_v11 = vsel %vm101_vm3, %v345_v8, %v373_v7 }
 0x2de   :  { %v340_v12 = vsel %vm338_vm2, %v337_v10, 0  ;;  %502 = vmatpush3.bf16.msra.mxu1 %v395_v11  ;;  %v335_v14 = vsel %vm333_vm5, %v332_v9, 0 }
 0x2df   :  { %v371_v13 = vrot.slane %v340_v12, 4  ;;  %503 = vmatprep.subr.bf16.mxu1 %v575_v18 }
 0x2e1   :  { %v324_v15 = vpop.permute.xlu0 %323  ;;  %v328_v16 = vpop.permute.xlu1 %327  ;;  %v392_v17 = vsel %vm101_vm3, %v335_v14, %v371_v13 }
 0x2e2   :  { %v330_v19 = vsel %vm74_vm0, %v328_v16, 0  ;;  %504 = vmatpush3.bf16.msra.mxu1 %v392_v17  ;;  %v326_v21 = vsel %vm65_vm1, %v324_v15, 0  ;;  %vm307_vm0 = vcmask 64512   ;;  %vm302_vm1 = vcmask 80896  }
 0x2e3   :  { %v369_v20 = vrot.slane %v330_v19, 4  ;;  %505 = vmatprep.subr.bf16.mxu1 %v575_v18 }
 0x2e5   :  { %v316_v22 = vpop.permute.xlu0 %315  ;;  %v320_v23 = vpop.permute.xlu1 %319  ;;  %v389_v24 = vsel %vm101_vm3, %v326_v21, %v369_v20 }
 0x2e6   :  { %v322_v25 = vsel %vm48_vm4, 0, %v320_v23  ;;  %506 = vmatpush3.bf16.msra.mxu1 %v389_v24  ;;  %v318_v27 = vsel %vm30_vm6, 0, %v316_v22  ;;  %vm297_vm4 = vcmask 97280   ;;  %vm292_vm6 = vcmask 113664  }
 0x2e7   :  { %507 = vmatprep.subr.bf16.mxu1 %v575_v18  ;;  %v386_v30 = vsel %vm101_vm3, %v322_v25, %v367_v26  ;;  %v366_v32 = vrot.slane %v318_v27, 4 }
 0x2e9   :  { %v306_v28 = vpop.permute.xlu0 %305  ;;  %v311_v29 = vpop.permute.xlu1 %310 }
 0x2ea   :  { %v314_v31 = vsel %vm312_vm7, 0, %v311_v29  ;;  %508 = vmatpush3.bf16.msra.mxu1 %v386_v30  ;;  %v309_v33 = vsel %vm307_vm0, 0, %v306_v28 }
 0x2eb   :  { %509 = vmatprep.subr.bf16.mxu1 %v575_v18  ;;  %v383_v36 = vsel %vm101_vm3, %v314_v31, %v366_v32  ;;  %v364_v38 = vrot.slane %v309_v33, 4 }
 0x2ed   :  { %v296_v34 = vpop.permute.xlu0 %295  ;;  %v301_v35 = vpop.permute.xlu1 %300 }
 0x2ee   :  { %v304_v37 = vsel %vm302_vm1, 0, %v301_v35  ;;  %510 = vmatpush3.bf16.msra.mxu1 %v383_v36  ;;  %v299_v39 = vsel %vm297_vm4, 0, %v296_v34 }
 0x2ef   :  { %511 = vmatprep.subr.bf16.mxu1 %v575_v18  ;;  %v380_v41 = vsel %vm101_vm3, %v304_v37, %v364_v38  ;;  %v362_v43 = vrot.slane %v299_v39, 4 }
 0x2f1   :  { %v291_v40 = vpop.permute.xlu1 %290 }
 0x2f2   :  { %v294_v42 = vsel %vm292_vm6, 0, %v291_v40  ;;  %512 = vmatpush3.bf16.msra.mxu1 %v380_v41 }
 0x2f3   :  { %513 = vmatprep.subr.bf16.mxu1 %v575_v18  ;;  %v377_v44 = vsel %vm101_vm3, %v294_v42, %v362_v43 }
 0x2f6   :  { %514 = vmatpush3.bf16.msra.mxu1 %v377_v44 }
 0x2f9   :  { %516 = vmatmul.mubr.bf16.vlgmr.msra.gmra.mxu1 %v400_v45 }
 0x2fa   :  { %v405_v46 = vpop.permute.xlu0 %404 }
 0x3b9   :  { %v441_v47 = vpop.f32.mrf.mxu1 }
 0x3ba   :  { %v442_v48 = vadd.f32 %v441_v47, %v405_v46 }
 0x3bb   :  { %v517_v49 = vpop.f32.mrf.mxu1 }
 0x3bc   :  { %v448_v50 = vmin.f32 %v442_v48, 0.0  ;;  %vm447_vm3 = vcmp.gt.f32.partialorder %v442_v48, 0.0 }
 0x3bd   :  { %v444_v51 = vpop.f32.mrf.mxu1 }
 0x3be   :  { %v449_v52 = vmul.f32 1.442695, %v448_v50 }
 0x3bf   :  { %v518_v53 = vpop.f32.mrf.mxu1 }
 0x3c0   :  { %547 = vpow2.f32 %v449_v52 }
 0x3cd   :  { %v548_v18 = vpop.eup %547 }
 0x3ce   :  { %v472_v54 = vadd.f32 -1.0, %v548_v18 }
 0x3d0   :  { %v452_v55 = vsel %vm447_vm3, %v442_v48, %v472_v54 }
 0x3d1   :  { %453 = vst.msk [vmem:[#allocation2] sm:$0xff] %vm187_vm8, %v452_v55 }
 0x3d2   :  { %560 = shalt.err (!%p557_p4)
}
 0x3d3   :  { %463 = dma.vmem_to_hbm [thread:$0]  %s461_s20, 128, %s798_s5, [#allocation3]  }
 0x3d4   :  { %569 = dma.done.wait [#allocation3], 128  }
 0x3d5   :  { %570 = vsyncadd [#allocation3], 4294967168 }
 0x3d6   :  { %467 = vsyncpa [#allocation3], 1 }

</bundles_post_ra>
